<compile_context>
chip_gen: v7x
topology: tpu7x:2x2x1
jax: 0.10.0
libtpu: 0.0.40
codegen_flags: <defaults>
</compile_context>

<pallas_src>
import jax
import jax.numpy as jnp
from jax import lax
from jax.experimental import pallas as pl
from jax.experimental.pallas import tpu as pltpu

INPUT_DIM = 32
OUT_DIM = 6
LN_EPS = 1e-5
_INV_SQRT2 = 0.7071067811865476

# Contract dim-1 of both operands: A (m,k) x B (n,k) -> (m,n)  ("A @ B^T").
_NT_DIMS = (((1,), (1,)), ((), ()))

# Abramowitz & Stegun 7.1.26 erf coefficients (max abs err ~1.5e-7).
_ERF_P = 0.3275911
_ERF_A = (0.254829592, -0.284496736, 1.421413741, -1.453152027, 1.061405429)


def _round_up(v, m):
    return ((v + m - 1) // m) * m


def _split_hi_lo(a):
    """f32 -> (bf16 hi, bf16 lo) with a ~= hi + lo.

    Used for deterministic ~f32-accurate MXU matmuls (3 bf16 passes with f32
    accumulation) regardless of backend / default matmul precision.
    """
    hi = a.astype(jnp.bfloat16)
    lo = (a - hi.astype(jnp.float32)).astype(jnp.bfloat16)
    return hi, lo


def _gelu_exact(h):
    """PyTorch F.gelu default (approximate='none'): 0.5*h*(1+erf(h/sqrt(2))).

    Sign-free A&S 7.1.26 form (only VPU/EUP ops, no select):
        z = |h|/sqrt(2);  P = poly(t)*exp(-z^2) = 1 - erf(z)
        gelu(h) = 0.5*(h + |h|*(1 - P))
    Exact division (EUP reciprocal + refine) -- no approx reciprocal, so the
    error stays at the ~1.5e-7 polynomial level.
    """
    # TODO(synk): for VALU-bound v7x, a direct minimax polynomial for
    # Phi(x)=0.5*(1+erf(x/sqrt(2))) would cut ~20-30% of the GELU VALU ops.
    ah = jnp.abs(h)
    z = ah * _INV_SQRT2
    t = 1.0 / (1.0 + _ERF_P * z)
    a1, a2, a3, a4, a5 = _ERF_A
    poly = ((((a5 * t + a4) * t + a3) * t + a2) * t + a1) * t
    p = poly * jnp.exp(-(z * z))  # = 1 - erf(|h|/sqrt(2))
    return 0.5 * (h + ah * (1.0 - p))


def anglenet_kernel(x_ref, w1h_ref, w1l_ref, b1_ref, w2h_ref, w2l_ref, b2_ref, o_ref):
    # x_ref: (tn, D) natural-layout token tile (no wrapper-side transpose).
    x = x_ref[...].astype(jnp.float32)
    x_hi, x_lo = _split_hi_lo(x)

    # proj1 (transposed result): h^T = W1 @ x^T  -> (D, tn), tokens on lanes.
    # bf16x3 split keeps ~f32 accuracy on every backend.
    def nt(a, b):
        return lax.dot_general(a, b, _NT_DIMS, preferred_element_type=jnp.float32)

    w1_hi = w1h_ref[...]
    h = nt(w1_hi, x_hi) + nt(w1_hi, x_lo) + nt(w1l_ref[...], x_hi)
    h = h + b1_ref[...]                      # (D, 1) broadcast over lanes

    # exact GELU -- lane-dense (all 128 lanes active)
    h = _gelu_exact(h)

    # LayerNorm over features (axis 0), two-pass moments for accuracy.
    # Affine (gamma, beta) is folded into W2'/b2' by the wrapper; the 1/sigma
    # scale commutes with the per-column matmul and is applied to the small
    # (OUT_DIM, tn) result instead of the (D, tn) tile.
    inv_d = 1.0 / float(h.shape[0])
    mu = jnp.sum(h, axis=0, keepdims=True) * inv_d          # (1, tn)
    d = h - mu
    var = jnp.sum(d * d, axis=0, keepdims=True) * inv_d     # (1, tn)
    r = lax.rsqrt(var + LN_EPS)                             # (1, tn)

    # proj2 (transposed): out^T = W2' @ d * r + b2'  -> (OUT_DIM, tn)
    d_hi, d_lo = _split_hi_lo(d)
    w2_hi = w2h_ref[...]
    m = (jnp.dot(w2_hi, d_hi, preferred_element_type=jnp.float32)
         + jnp.dot(w2_hi, d_lo, preferred_element_type=jnp.float32)
         + jnp.dot(w2l_ref[...], d_hi, preferred_element_type=jnp.float32))
    o_ref[...] = (m * r + b2_ref[...]).astype(o_ref.dtype)


def anglenet_forward(x, params, *, block_tokens=8192):
    """x: (B, L, D) float32 -> (B, L, OUT_DIM)."""
    w1, b1, gamma, beta, w2, b2 = params
    B, L, D = x.shape
    assert D == INPUT_DIM
    out_dim = w2.shape[0]
    N = B * L
    x2 = x.reshape(N, D)                      # natural layout, no copy

    # Fold the LayerNorm affine into proj2 (exact algebraic identity).
    w2p = w2 * gamma[None, :]
    b2p = w2 @ beta + b2

    # hi/lo bf16 splits of the (tiny) weights, once at trace time.
    w1_hi, w1_lo = _split_hi_lo(w1)
    w2_hi, w2_lo = _split_hi_lo(w2p)
    b1c = b1.reshape(D, 1)
    b2c = b2p.reshape(out_dim, 1)

    # Token tile: multiple of 8 (sublanes); once multi-block it is a multiple
    # of 128 so the (OUT_DIM, tn) output blocks stay lane-aligned.
    tn = min(_round_up(block_tokens, 128), _round_up(N, 8))
    nb = pl.cdiv(N, tn)
    n_out = nb * tn

    # Ragged last block (N % tn != 0): garbage tokens are per-token independent
    # under LayerNorm (no cross-token reduction anywhere) and are sliced off.
    # Scoped VMEM: ~tn*1.6 KiB needed; ask for headroom (<= 64 MiB, v7x safe).
    vmem_limit = int(min(max(32 * 1024 * 1024, 3 * tn * 1024), 64 * 1024 * 1024))

    outT = pl.pallas_call(
        anglenet_kernel,
        out_shape=jax.ShapeDtypeStruct((out_dim, n_out), x.dtype),
        grid=(nb,),
        in_specs=[
            pl.BlockSpec((tn, D), lambda i: (i, 0)),          # x tile (natural)
            pl.BlockSpec((D, D), lambda i: (0, 0)),           # w1 hi (bf16)
            pl.BlockSpec((D, D), lambda i: (0, 0)),           # w1 lo (bf16)
            pl.BlockSpec((D, 1), lambda i: (0, 0)),           # b1 column
            pl.BlockSpec((out_dim, D), lambda i: (0, 0)),     # w2' hi (bf16)
            pl.BlockSpec((out_dim, D), lambda i: (0, 0)),     # w2' lo (bf16)
            pl.BlockSpec((out_dim, 1), lambda i: (0, 0)),     # b2' column
        ],
        out_specs=pl.BlockSpec((out_dim, tn), lambda i: (0, i)),
        compiler_params=pltpu.CompilerParams(
            # single parallel axis: shards across the 2 TensorCores on v7x
            dimension_semantics=("parallel",),
            vmem_limit_bytes=vmem_limit,
        ),
    )(x2, w1_hi, w1_lo, b1c, w2_hi, w2_lo, b2c)

    # Small wrapper-side transpose of the (OUT_DIM, N) result only (~24 B/token).
    return jnp.swapaxes(outT[:, :N], 0, 1).reshape(B, L, out_dim)


def init_params(key, input_dim=INPUT_DIM, out_dim=OUT_DIM):
    # PyTorch-style layouts: Linear weights (out, in), 1-D biases / LN params.
    k1, k2, k3, k4, k5, k6 = jax.random.split(key, 6)
    bound = float(input_dim) ** -0.5
    w1 = jax.random.uniform(k1, (input_dim, input_dim), jnp.float32, -bound, bound)
    b1 = jax.random.uniform(k2, (input_dim,), jnp.float32, -bound, bound)
    gamma = 1.0 + 0.1 * jax.random.normal(k3, (input_dim,), jnp.float32)
    beta = 0.1 * jax.random.normal(k4, (input_dim,), jnp.float32)
    w2 = jax.random.uniform(k5, (out_dim, input_dim), jnp.float32, -bound, bound)
    b2 = jax.random.uniform(k6, (out_dim,), jnp.float32, -bound, bound)
    return (w1, b1, gamma, beta, w2, b2)


def anglenet_reference(x, params):
    """Pure-JAX reference matching PyTorch semantics (exact-erf GELU)."""
    w1, b1, gamma, beta, w2, b2 = params
    hp = lax.Precision.HIGHEST
    h = jnp.einsum("...i,oi->...o", x, w1, precision=hp) + b1
    h = 0.5 * h * (1.0 + lax.erf(h * _INV_SQRT2))
    mu = jnp.mean(h, axis=-1, keepdims=True)
    var = jnp.mean(jnp.square(h - mu), axis=-1, keepdims=True)
    hn = (h - mu) * lax.rsqrt(var + LN_EPS) * gamma + beta
    return jnp.einsum("...i,oi->...o", hn, w2, precision=hp) + b2


if __name__ == "__main__":
    key = jax.random.PRNGKey(0)
    kx, kp, kx2 = jax.random.split(key, 3)

    params = init_params(kp)

    # Small single-block case (B=2, L=8 -> 16 tokens, exact-fit tile).
    B, L = 2, 8
    x = jax.random.normal(kx, (B, L, INPUT_DIM), jnp.float32)
    out = jax.block_until_ready(anglenet_forward(x, params))
    ref = anglenet_reference(x, params)
    assert out.shape == (B, L, OUT_DIM)
    err = float(jnp.max(jnp.abs(out - ref)))
    assert err < 1e-3, f"kernel output mismatch vs reference (max abs err = {err})"

    # Multi-block grid path (still tiny): 384 tokens, 3 tiles of 128.
    x_big = jax.random.normal(kx2, (4, 96, INPUT_DIM), jnp.float32)
    out_big = jax.block_until_ready(
        anglenet_forward(x_big, params, block_tokens=128))
    ref_big = anglenet_reference(x_big, params)
    err_big = float(jnp.max(jnp.abs(out_big - ref_big)))
    assert err_big < 1e-3, f"multi-block mismatch (max abs err = {err_big})"

    print("KERNEL_OK")
</pallas_src>

<mosaic_0001>
module attributes {stable_mosaic.version = 11 : i64} {
  func.func @anglenet_kernel(%arg0: i32, %arg1: memref<16x32xf32, #tpu.memory_space<vmem>>, %arg2: memref<32x32xbf16, #tpu.memory_space<vmem>>, %arg3: memref<32x32xbf16, #tpu.memory_space<vmem>>, %arg4: memref<32x1xf32, #tpu.memory_space<vmem>>, %arg5: memref<6x32xbf16, #tpu.memory_space<vmem>>, %arg6: memref<6x32xbf16, #tpu.memory_space<vmem>>, %arg7: memref<6x1xf32, #tpu.memory_space<vmem>>, %arg8: memref<6x16xf32, #tpu.memory_space<vmem>>) attributes {dimension_semantics = [#tpu.dimension_semantics<parallel>], iteration_bounds = array<i64: 1>, scalar_prefetch = 0 : i64, scratch_operands = 0 : i64, tpu.core_type = #tpu.core_type<tc>, window_params = [{transform_indices = @transform_0, window_bounds = array<i64: 16, 32>}, {pipeline_mode = #tpu.pipeline_mode<synchronous>, transform_indices = @transform_1, window_bounds = array<i64: 32, 32>}, {pipeline_mode = #tpu.pipeline_mode<synchronous>, transform_indices = @transform_2, window_bounds = array<i64: 32, 32>}, {pipeline_mode = #tpu.pipeline_mode<synchronous>, transform_indices = @transform_3, window_bounds = array<i64: 32, 1>}, {pipeline_mode = #tpu.pipeline_mode<synchronous>, transform_indices = @transform_4, window_bounds = array<i64: 6, 32>}, {pipeline_mode = #tpu.pipeline_mode<synchronous>, transform_indices = @transform_5, window_bounds = array<i64: 6, 32>}, {pipeline_mode = #tpu.pipeline_mode<synchronous>, transform_indices = @transform_6, window_bounds = array<i64: 6, 1>}, {transform_indices = @transform_7, window_bounds = array<i64: 6, 16>}]} {
    %c0 = arith.constant 0 : index
    %c0_0 = arith.constant 0 : index
    %0 = vector.load %arg1[%c0, %c0_0] : memref<16x32xf32, #tpu.memory_space<vmem>>, vector<16x32xf32>
    %1 = arith.truncf %0 : vector<16x32xf32> to vector<16x32xbf16>
    %2 = arith.extf %1 : vector<16x32xbf16> to vector<16x32xf32>
    %3 = arith.subf %0, %2 : vector<16x32xf32>
    %4 = arith.truncf %3 : vector<16x32xf32> to vector<16x32xbf16>
    %c0_1 = arith.constant 0 : index
    %c0_2 = arith.constant 0 : index
    %5 = vector.load %arg2[%c0_1, %c0_2] : memref<32x32xbf16, #tpu.memory_space<vmem>>, vector<32x32xbf16>
    %cst = arith.constant dense<0.000000e+00> : vector<32x16xf32>
    %6 = tpu.matmul %5, %1, %cst {dimension_numbers = #tpu.dot_dimension_numbers<[1], [1], [0], [0], [0, 0, 1, 0], [], []>} : vector<32x32xbf16>, vector<16x32xbf16>, vector<32x16xf32> -> vector<32x16xf32>
    %cst_3 = arith.constant dense<0.000000e+00> : vector<32x16xf32>
    %7 = tpu.matmul %5, %4, %cst_3 {dimension_numbers = #tpu.dot_dimension_numbers<[1], [1], [0], [0], [0, 0, 1, 0], [], []>} : vector<32x32xbf16>, vector<16x32xbf16>, vector<32x16xf32> -> vector<32x16xf32>
    %8 = arith.addf %6, %7 : vector<32x16xf32>
    %c0_4 = arith.constant 0 : index
    %c0_5 = arith.constant 0 : index
    %9 = vector.load %arg3[%c0_4, %c0_5] : memref<32x32xbf16, #tpu.memory_space<vmem>>, vector<32x32xbf16>
    %cst_6 = arith.constant dense<0.000000e+00> : vector<32x16xf32>
    %10 = tpu.matmul %9, %1, %cst_6 {dimension_numbers = #tpu.dot_dimension_numbers<[1], [1], [0], [0], [0, 0, 1, 0], [], []>} : vector<32x32xbf16>, vector<16x32xbf16>, vector<32x16xf32> -> vector<32x16xf32>
    %11 = arith.addf %8, %10 : vector<32x16xf32>
    %c0_7 = arith.constant 0 : index
    %c0_8 = arith.constant 0 : index
    %12 = vector.load %arg4[%c0_7, %c0_8] : memref<32x1xf32, #tpu.memory_space<vmem>>, vector<32x1xf32>
    %13 = vector.broadcast %12 : vector<32x1xf32> to vector<32x16xf32>
    %14 = arith.addf %11, %13 : vector<32x16xf32>
    %15 = math.absf %14 : vector<32x16xf32>
    %cst_9 = arith.constant 0.707106769 : f32
    %16 = vector.broadcast %cst_9 : f32 to vector<32x16xf32>
    %17 = arith.mulf %15, %16 : vector<32x16xf32>
    %cst_10 = arith.constant 0.327591091 : f32
    %18 = vector.broadcast %cst_10 : f32 to vector<32x16xf32>
    %19 = arith.mulf %18, %17 : vector<32x16xf32>
    %cst_11 = arith.constant 1.000000e+00 : f32
    %20 = vector.broadcast %cst_11 : f32 to vector<32x16xf32>
    %21 = arith.addf %20, %19 : vector<32x16xf32>
    %cst_12 = arith.constant 1.000000e+00 : f32
    %22 = vector.broadcast %cst_12 : f32 to vector<32x16xf32>
    %23 = arith.divf %22, %21 : vector<32x16xf32>
    %cst_13 = arith.constant 1.06140542 : f32
    %24 = vector.broadcast %cst_13 : f32 to vector<32x16xf32>
    %25 = arith.mulf %24, %23 : vector<32x16xf32>
    %cst_14 = arith.constant -1.45315206 : f32
    %26 = vector.broadcast %cst_14 : f32 to vector<32x16xf32>
    %27 = arith.addf %25, %26 : vector<32x16xf32>
    %28 = arith.mulf %27, %23 : vector<32x16xf32>
    %cst_15 = arith.constant 1.42141378 : f32
    %29 = vector.broadcast %cst_15 : f32 to vector<32x16xf32>
    %30 = arith.addf %28, %29 : vector<32x16xf32>
    %31 = arith.mulf %30, %23 : vector<32x16xf32>
    %cst_16 = arith.constant -0.284496725 : f32
    %32 = vector.broadcast %cst_16 : f32 to vector<32x16xf32>
    %33 = arith.addf %31, %32 : vector<32x16xf32>
    %34 = arith.mulf %33, %23 : vector<32x16xf32>
    %cst_17 = arith.constant 0.254829586 : f32
    %35 = vector.broadcast %cst_17 : f32 to vector<32x16xf32>
    %36 = arith.addf %34, %35 : vector<32x16xf32>
    %37 = arith.mulf %36, %23 : vector<32x16xf32>
    %38 = arith.mulf %17, %17 : vector<32x16xf32>
    %cst_18 = arith.constant 0.000000e+00 : f32
    %39 = vector.broadcast %cst_18 : f32 to vector<32x16xf32>
    %40 = arith.subf %39, %38 : vector<32x16xf32>
    %41 = math.exp %40 : vector<32x16xf32>
    %42 = arith.mulf %37, %41 : vector<32x16xf32>
    %cst_19 = arith.constant 1.000000e+00 : f32
    %43 = vector.broadcast %cst_19 : f32 to vector<32x16xf32>
    %44 = arith.subf %43, %42 : vector<32x16xf32>
    %45 = arith.mulf %15, %44 : vector<32x16xf32>
    %46 = arith.addf %14, %45 : vector<32x16xf32>
    %cst_20 = arith.constant 5.000000e-01 : f32
    %47 = vector.broadcast %cst_20 : f32 to vector<32x16xf32>
    %48 = arith.mulf %47, %46 : vector<32x16xf32>
    %cst_21 = arith.constant dense<0.000000e+00> : vector<16xf32>
    %49 = vector.multi_reduction <add>, %48, %cst_21 [0] : vector<32x16xf32> to vector<16xf32>
    %50 = vector.shape_cast %49 : vector<16xf32> to vector<1x16xf32>
    %cst_22 = arith.constant 3.125000e-02 : f32
    %51 = vector.broadcast %cst_22 : f32 to vector<1x16xf32>
    %52 = arith.mulf %50, %51 : vector<1x16xf32>
    %53 = vector.broadcast %52 : vector<1x16xf32> to vector<32x16xf32>
    %54 = arith.subf %48, %53 : vector<32x16xf32>
    %55 = arith.mulf %54, %54 : vector<32x16xf32>
    %cst_23 = arith.constant dense<0.000000e+00> : vector<16xf32>
    %56 = vector.multi_reduction <add>, %55, %cst_23 [0] : vector<32x16xf32> to vector<16xf32>
    %57 = vector.shape_cast %56 : vector<16xf32> to vector<1x16xf32>
    %cst_24 = arith.constant 3.125000e-02 : f32
    %58 = vector.broadcast %cst_24 : f32 to vector<1x16xf32>
    %59 = arith.mulf %57, %58 : vector<1x16xf32>
    %cst_25 = arith.constant 9.99999974E-6 : f32
    %60 = vector.broadcast %cst_25 : f32 to vector<1x16xf32>
    %61 = arith.addf %59, %60 : vector<1x16xf32>
    %62 = math.rsqrt %61 : vector<1x16xf32>
    %63 = arith.truncf %54 : vector<32x16xf32> to vector<32x16xbf16>
    %64 = arith.extf %63 : vector<32x16xbf16> to vector<32x16xf32>
    %65 = arith.subf %54, %64 : vector<32x16xf32>
    %66 = arith.truncf %65 : vector<32x16xf32> to vector<32x16xbf16>
    %c0_26 = arith.constant 0 : index
    %c0_27 = arith.constant 0 : index
    %67 = vector.load %arg5[%c0_26, %c0_27] : memref<6x32xbf16, #tpu.memory_space<vmem>>, vector<6x32xbf16>
    %cst_28 = arith.constant dense<0.000000e+00> : vector<6x16xf32>
    %68 = tpu.matmul %67, %63, %cst_28 {dimension_numbers = #tpu.dot_dimension_numbers<[1], [0], [0], [1], [0, 0, 1, 1], [], []>} : vector<6x32xbf16>, vector<32x16xbf16>, vector<6x16xf32> -> vector<6x16xf32>
    %cst_29 = arith.constant dense<0.000000e+00> : vector<6x16xf32>
    %69 = tpu.matmul %67, %66, %cst_29 {dimension_numbers = #tpu.dot_dimension_numbers<[1], [0], [0], [1], [0, 0, 1, 1], [], []>} : vector<6x32xbf16>, vector<32x16xbf16>, vector<6x16xf32> -> vector<6x16xf32>
    %70 = arith.addf %68, %69 : vector<6x16xf32>
    %c0_30 = arith.constant 0 : index
    %c0_31 = arith.constant 0 : index
    %71 = vector.load %arg6[%c0_30, %c0_31] : memref<6x32xbf16, #tpu.memory_space<vmem>>, vector<6x32xbf16>
    %cst_32 = arith.constant dense<0.000000e+00> : vector<6x16xf32>
    %72 = tpu.matmul %71, %63, %cst_32 {dimension_numbers = #tpu.dot_dimension_numbers<[1], [0], [0], [1], [0, 0, 1, 1], [], []>} : vector<6x32xbf16>, vector<32x16xbf16>, vector<6x16xf32> -> vector<6x16xf32>
    %73 = arith.addf %70, %72 : vector<6x16xf32>
    %74 = vector.broadcast %62 : vector<1x16xf32> to vector<6x16xf32>
    %75 = arith.mulf %73, %74 : vector<6x16xf32>
    %c0_33 = arith.constant 0 : index
    %c0_34 = arith.constant 0 : index
    %76 = vector.load %arg7[%c0_33, %c0_34] : memref<6x1xf32, #tpu.memory_space<vmem>>, vector<6x1xf32>
    %77 = vector.broadcast %76 : vector<6x1xf32> to vector<6x16xf32>
    %78 = arith.addf %75, %77 : vector<6x16xf32>
    %c0_35 = arith.constant 0 : index
    %c0_36 = arith.constant 0 : index
    %79 = vector.load %arg8[%c0_35, %c0_36] : memref<6x16xf32, #tpu.memory_space<vmem>>, vector<6x16xf32>
    tpu.vector_store %arg8[%c0_35, %c0_36], %78 {strides = array<i32>} : memref<6x16xf32, #tpu.memory_space<vmem>>, vector<6x16xf32>,
    return
  }
  func.func @transform_0(%arg0: i32) -> (i32, i32) {
    %c0_i32 = arith.constant 0 : i32
    %c0_i32_0 = arith.constant 0 : i32
    return %arg0, %c0_i32 : i32, i32
  }
  func.func @transform_1(%arg0: i32) -> (i32, i32) {
    %c0_i32 = arith.constant 0 : i32
    %c0_i32_0 = arith.constant 0 : i32
    %c0_i32_1 = arith.constant 0 : i32
    return %c0_i32, %c0_i32_0 : i32, i32
  }
  func.func @transform_2(%arg0: i32) -> (i32, i32) {
    %c0_i32 = arith.constant 0 : i32
    %c0_i32_0 = arith.constant 0 : i32
    %c0_i32_1 = arith.constant 0 : i32
    return %c0_i32, %c0_i32_0 : i32, i32
  }
  func.func @transform_3(%arg0: i32) -> (i32, i32) {
    %c0_i32 = arith.constant 0 : i32
    %c0_i32_0 = arith.constant 0 : i32
    %c0_i32_1 = arith.constant 0 : i32
    return %c0_i32, %c0_i32_0 : i32, i32
  }
  func.func @transform_4(%arg0: i32) -> (i32, i32) {
    %c0_i32 = arith.constant 0 : i32
    %c0_i32_0 = arith.constant 0 : i32
    %c0_i32_1 = arith.constant 0 : i32
    return %c0_i32, %c0_i32_0 : i32, i32
  }
  func.func @transform_5(%arg0: i32) -> (i32, i32) {
    %c0_i32 = arith.constant 0 : i32
    %c0_i32_0 = arith.constant 0 : i32
    %c0_i32_1 = arith.constant 0 : i32
    return %c0_i32, %c0_i32_0 : i32, i32
  }
  func.func @transform_6(%arg0: i32) -> (i32, i32) {
    %c0_i32 = arith.constant 0 : i32
    %c0_i32_0 = arith.constant 0 : i32
    %c0_i32_1 = arith.constant 0 : i32
    return %c0_i32, %c0_i32_0 : i32, i32
  }
  func.func @transform_7(%arg0: i32) -> (i32, i32) {
    %c0_i32 = arith.constant 0 : i32
    %c0_i32_0 = arith.constant 0 : i32
    return %c0_i32, %arg0 : i32, i32
  }
}

</mosaic_0001>

<bundles_post_ra>
// kernel: tpu_custom_call.1
= control target key start
LH: loop header
LB: loop body
LE: loop exit
PB: predicated region body
PF: predicated region fallthrough
CT: control target
= control target key end

     0   :  { %v706_v4 = vmov 0   ;;  %vm50_vm0 = vcmask 261120   ;;  %s867_s0 = inlined_call_operand.vmem [shape: f32[16,32], index: 0, kind: input, shape index: {}]   ;;  %s868_s1 = inlined_call_operand.vmem [shape: bf16[32,32], index: 1, kind: input, shape index: {}]   ;;  %s869_s2 = inlined_call_operand.vmem [shape: bf16[32,32], index: 2, kind: input, shape index: {}]   ;;  %s870_s3 = inlined_call_operand.vmem [shape: f32[32,1], index: 3, kind: input, shape index: {}]   ;;  %s871_s4 = inlined_call_operand.vmem [shape: bf16[6,32], index: 4, kind: input, shape index: {}]   ;;  %s872_s5 = inlined_call_operand.vmem [shape: bf16[6,32], index: 5, kind: input, shape index: {}]   ;;  %s873_s6 = inlined_call_operand.vmem [shape: f32[6,1], index: 6, kind: input, shape index: {}]   ;;  %s874_s7 = inlined_call_operand.hbm [shape: f32[6,16], index: 7, kind: output, shape index: {}]  }
   0x1   :  { %v28_v0 = vld [vmem:[%s867_s0] sm:$0xff]  ;;  %v29_v1 = vld [vmem:[%s867_s0 + $0x8] sm:$0xff]  ;;  %658 = vset.pattern.permute.xlu0 %v706_v4  ;;  %659 = vset.pattern.permute.xlu1 %v706_v4  ;;  %v236_v10 = vld [vmem:[%s870_s3 + $0x10] sm:$0xff] }
   0x2   :  { %v30_v2 = vpack.c.bf16 %v29_v1, %v28_v0  ;;  %v660_v3 = vld [vmem:[%s868_s1] sm:$0xff]   ;;  %v235_v11 = vld [vmem:[%s870_s3 + $0x8] sm:$0xff]  ;;  %250 = vperm.xlu1 %659, %v236_v10  }
   0x3   :  { %595 = vmatprep.mubr.msk.bf16.mxu0 %vm50_vm0, %v660_v3  ;;  %v234_v7 = vld [vmem:[%s870_s3] sm:$0xff] }
   0x4   :  { %v31_v5 = vunpack.c.l.bf16 %v30_v2  ;;  %v32_v6 = vunpack.c.h.bf16 %v30_v2  ;;  %240 = vperm.xlu0 %658, %v234_v7  }
   0x6   :  { %v33_v8 = vsub.f32 %v28_v0, %v31_v5  ;;  %v34_v9 = vsub.f32 %v29_v1, %v32_v6 }
   0x7   :  { %12 = vsyncpa [#allocation3], 0  ;;  %v237_v13 = vld [vmem:[%s870_s3 + $0x18] sm:$0xff]  ;;  %v539_v15 = vld [vmem:[%s873_s6] sm:$0x3f]  ;;  %v110_v17 = vsel %vm50_vm0, %v30_v2, 0 }
   0x8   :  { %v35_v12 = vpack.c.bf16 %v34_v9, %v33_v8  ;;  %245 = vperm.xlu0 %658, %v235_v11   ;;  %255 = vperm.xlu1 %659, %v237_v13   ;;  %v661_v16 = vld [vmem:[%s868_s1 + $0x8] sm:$0xff]   ;;  %v662_v18 = vld [vmem:[%s869_s2] sm:$0xff]   ;;  %v707_v20 = vmov 0.0   ;;  %vm708_vm1 = vmmov 0   ;;  %vm358_vm2 = vcmask 130048   ;;  %s709_s21 = smov [#allocation2]  }
   0x9   :  { %v663_v19 = vld [vmem:[%s869_s2 + $0x8] sm:$0xff]   ;;  %611 = vmatprep.subr.bf16.mxu1 %v707_v20  ;;  %615 = vmatprep.mubr.msk.bf16.mxu1 %vm708_vm1, %v707_v20  ;;  %s554_s22 = sshll.u32 %s709_s21, 4  ;;  %vm546_vm3 = vcmask 128000   ;;  %s555_s22 = int_to_ptr.vmem [resolvable:$true] %s554_s22 }
   0xa   :  { %651 = vmatprep.subr.msk.bf16.mxu0 %vm50_vm0, %v35_v12  ;;  %v58_v14 = vsel %vm50_vm0, %v35_v12, 0  ;;  %p687_p1 = scmp.lt.s32.totalorder %s555_s22, %s555_s22 }
   0xb   :  { %594 = vmatpush3.bf16.xpose.msra.mxu0 %v58_v14 }
   0xc   :  { %652 = vmatprep.subr.msk.bf16.mxu0 %vm50_vm0, %v30_v2  ;;  %542 = vperm.xlu0 %658, %v539_v15  }
  0x12   :  { %596 = vmatmul.mubr.msk.bf16.vlgmr.msra.gmra.mrb[0].mxu0 %vm50_vm0, %v661_v16 }
  0x13   :  { %600 = vmatpush3.bf16.xpose.msra.mxu0 %v110_v17  ;;  %601 = vmatprep.mubr.msk.bf16.mxu0 %vm50_vm0, %v660_v3 }
  0x14   :  { %653 = vmatprep.subr.msk.bf16.mxu0 %vm50_vm0, %v30_v2 }
  0x1e   :  { %602 = vmatmul.mubr.msk.bf16.vlgmr.msra.gmra.mrb[0].mxu0 %vm50_vm0, %v661_v16 }
  0x1f   :  { %606 = vmatpush3.bf16.xpose.msra.mxu0 %v110_v17  ;;  %607 = vmatprep.mubr.msk.bf16.mxu0 %vm50_vm0, %v662_v18 }
  0x2a   :  { %608 = vmatmul.mubr.msk.bf16.vlgmr.msra.gmra.mrb[0].mxu0 %vm50_vm0, %v663_v19 }
  0x81   :  { %v251_v21 = vpop.permute.xlu1 %250 }
  0x83   :  { %v241_v22 = vpop.permute.xlu0 %240 }
  0x87   :  { %v256_v24 = vpop.permute.xlu1 %255  ;;  %v246_v29 = vpop.permute.xlu0 %245 }
  0xfd   :  { %v609_v23 = vpop.f32.mrb[0].mxu0 }
  0xfe   :  { %v797_v25 = vadd.f32 %v609_v23, %v251_v21  ;;  %v215_v26 = vpop.f32.mrb[1].mxu0 }
  0xff   :  { %v799_v27 = vadd.f32 %v241_v22, %v215_v26  ;;  %v610_v28 = vpop.f32.mrb[2].mxu0 }
 0x100   :  { %v264_v30 = vand.u32 2147483647, %v797_v25  ;;  %v802_v31 = vadd.f32 %v610_v28, %v256_v24  ;;  %v218_v32 = vpop.f32.mrb[3].mxu0 }
 0x101   :  { %v262_v33 = vand.u32 2147483647, %v799_v27  ;;  %v805_v34 = vadd.f32 %v246_v29, %v218_v32 }
 0x102   :  { %v268_v35 = vmul.f32 0.70710677, %v264_v30  ;;  %v265_v36 = vand.u32 2147483647, %v802_v31 }
 0x103   :  { %v266_v37 = vmul.f32 0.70710677, %v262_v33  ;;  %v263_v38 = vand.u32 2147483647, %v805_v34 }
 0x104   :  { %v272_v39 = vmul.f32 0.3275911, %v268_v35  ;;  %v269_v40 = vmul.f32 0.70710677, %v265_v36  ;;  %v324_v49 = vmul.f32 %v268_v35, %v268_v35 }
 0x105   :  { %v270_v41 = vmul.f32 0.3275911, %v266_v37  ;;  %v267_v42 = vmul.f32 0.70710677, %v263_v38  ;;  %v322_v50 = vmul.f32 %v266_v37, %v266_v37 }
 0x106   :  { %v276_v43 = vadd.f32 1.0, %v272_v39  ;;  %v273_v44 = vmul.f32 0.3275911, %v269_v40  ;;  %v328_v52 = vsub.f32 0.0, %v324_v49  ;;  %v325_v53 = vmul.f32 %v269_v40, %v269_v40 }
 0x107   :  { %v274_v45 = vadd.f32 1.0, %v270_v41  ;;  %v271_v46 = vmul.f32 0.3275911, %v267_v42  ;;  %v326_v56 = vsub.f32 0.0, %v322_v50  ;;  %v323_v58 = vmul.f32 %v267_v42, %v267_v42 }
 0x108   :  { %664 = vrcp.f32 %v276_v43  ;;  %v277_v47 = vadd.f32 1.0, %v273_v44  ;;  %v334_v61 = vmul.f32 1.442695, %v328_v52  ;;  %v329_v63 = vsub.f32 0.0, %v325_v53 }
 0x109   :  { %666 = vrcp.f32 %v274_v45  ;;  %v275_v48 = vadd.f32 1.0, %v271_v46  ;;  %v330_v1 = vmul.f32 1.442695, %v326_v56  ;;  %v327_v5 = vsub.f32 0.0, %v323_v58 }
 0x10a   :  { %668 = vrcp.f32 %v277_v47  ;;  %v336_v10 = vmul.f32 1.442695, %v329_v63 }
 0x10b   :  { %670 = vrcp.f32 %v275_v48  ;;  %v332_v15 = vmul.f32 1.442695, %v327_v5 }
 0x10c   :  { %672 = vpow2.f32 %v334_v61 }
 0x10d   :  { %674 = vpow2.f32 %v330_v1 }
 0x10e   :  { %676 = vpow2.f32 %v336_v10 }
 0x10f   :  { %678 = vpow2.f32 %v332_v15 }
 0x112   :  { %v665_v51 = vpop.eup %664 }
 0x113   :  { %v667_v54 = vpop.eup %666  ;;  %v288_v55 = vmul.f32 1.0614054, %v665_v51 }
 0x114   :  { %v286_v57 = vmul.f32 1.0614054, %v667_v54  ;;  %v669_v60 = vpop.eup %668 }
 0x115   :  { %v292_v59 = vadd.f32 -1.4531521, %v288_v55  ;;  %v289_v2 = vmul.f32 1.0614054, %v669_v60  ;;  %v671_v3 = vpop.eup %670 }
 0x116   :  { %v290_v62 = vadd.f32 -1.4531521, %v286_v57  ;;  %v287_v8 = vmul.f32 1.0614054, %v671_v3  ;;  %v673_v40 = vpop.eup %672 }
 0x117   :  { %v296_v0 = vmul.f32 %v665_v51, %v292_v59  ;;  %v293_v7 = vadd.f32 -1.4531521, %v289_v2  ;;  %v675_v42 = vpop.eup %674 }
 0x118   :  { %v294_v4 = vmul.f32 %v667_v54, %v290_v62  ;;  %v291_v13 = vadd.f32 -1.4531521, %v287_v8  ;;  %v677_v50 = vpop.eup %676 }
 0x119   :  { %v300_v6 = vadd.f32 1.4214138, %v296_v0  ;;  %v297_v12 = vmul.f32 %v669_v60, %v293_v7  ;;  %v679_v56 = vpop.eup %678 }
 0x11a   :  { %v298_v9 = vadd.f32 1.4214138, %v294_v4  ;;  %v295_v18 = vmul.f32 %v671_v3, %v291_v13 }
 0x11b   :  { %v304_v11 = vmul.f32 %v665_v51, %v300_v6  ;;  %v301_v17 = vadd.f32 1.4214138, %v297_v12 }
 0x11c   :  { %v302_v14 = vmul.f32 %v667_v54, %v298_v9  ;;  %v299_v23 = vadd.f32 1.4214138, %v295_v18 }
 0x11d   :  { %v308_v16 = vadd.f32 -0.28449672, %v304_v11  ;;  %v305_v22 = vmul.f32 %v669_v60, %v301_v17 }
 0x11e   :  { %v306_v19 = vadd.f32 -0.28449672, %v302_v14  ;;  %v303_v29 = vmul.f32 %v671_v3, %v299_v23 }
 0x11f   :  { %v312_v21 = vmul.f32 %v665_v51, %v308_v16  ;;  %v309_v28 = vadd.f32 -0.28449672, %v305_v22 }
 0x120   :  { %v310_v24 = vmul.f32 %v667_v54, %v306_v19  ;;  %v307_v39 = vadd.f32 -0.28449672, %v303_v29 }
 0x121   :  { %v316_v26 = vadd.f32 0.2548296, %v312_v21  ;;  %v313_v37 = vmul.f32 %v669_v60, %v309_v28 }
 0x122   :  { %v314_v32 = vadd.f32 0.2548296, %v310_v24  ;;  %v311_v45 = vmul.f32 %v671_v3, %v307_v39 }
 0x123   :  { %v320_v35 = vmul.f32 %v665_v51, %v316_v26  ;;  %v317_v44 = vadd.f32 0.2548296, %v313_v37 }
 0x124   :  { %v318_v41 = vmul.f32 %v667_v54, %v314_v32  ;;  %v315_v49 = vadd.f32 0.2548296, %v311_v45 }
 0x125   :  { %v340_v43 = vmul.f32 %v673_v40, %v320_v35  ;;  %v321_v48 = vmul.f32 %v669_v60, %v317_v44 }
 0x126   :  { %v338_v46 = vmul.f32 %v675_v42, %v318_v41  ;;  %v319_v55 = vmul.f32 %v671_v3, %v315_v49  ;;  %v493_v49 = vld [vmem:[%s872_s5] sm:$0x7]  ;;  %s682_s5 = scalar_lea.vmem %s555_s22, 128 }
 0x127   :  { %v344_v47 = vsub.f32 1.0, %v340_v43  ;;  %v341_v53 = vmul.f32 %v677_v50, %v321_v48  ;;  %v409_v48 = vld [vmem:[%s871_s4] sm:$0x7]  ;;  %p683_p0 = scmp.ne.s32.totalorder %s555_s22, %s682_s5  ;;  %p688_p2 = scmp.lt.s32.totalorder %s682_s5, %s682_s5 }
 0x128   :  { %v342_v52 = vsub.f32 1.0, %v338_v46  ;;  %v339_v58 = vmul.f32 %v679_v56, %v319_v55 }
 0x129   :  { %v348_v57 = vmul.f32 %v344_v47, %v264_v30  ;;  %v345_v54 = vsub.f32 1.0, %v341_v53  ;;  %p689_p3 = por %p688_p2, %p687_p1 }
 0x12a   :  { %v346_v51 = vmul.f32 %v342_v52, %v262_v33  ;;  %v343_v60 = vsub.f32 1.0, %v339_v58 }
 0x12b   :  { %v349_v61 = vmul.f32 %v345_v54, %v265_v36  ;;  %v352_v62 = vadd.f32 %v348_v57, %v797_v25  ;;  %p690_p4 = pnand %p689_p3, %p683_p0 }
 0x12c   :  { %v350_v59 = vadd.f32 %v346_v51, %v799_v27  ;;  %v347_v63 = vmul.f32 %v343_v60, %v263_v38  ;;  %v543_v60 = vpop.permute.xlu0 %542 }
 0x12d   :  { %v353_v1 = vadd.f32 %v349_v61, %v802_v31  ;;  %v356_v30 = vmul.f32 0.5, %v352_v62 }
 0x12e   :  { %v354_v0 = vmul.f32 0.5, %v350_v59  ;;  %v351_v33 = vadd.f32 %v347_v63, %v805_v34 }
 0x12f   :  { %v357_v27 = vmul.f32 0.5, %v353_v1  ;;  %v362_v5 = vsel %vm358_vm2, %v356_v30, 0.0 }
 0x130   :  { %v355_v2 = vmul.f32 0.5, %v351_v33  ;;  %v359_v3 = vsel %vm358_vm2, %v354_v0, 0.0 }
 0x131   :  { %v364_v6 = vsel %vm358_vm2, %v357_v27, 0.0 }
 0x132   :  { %v360_v4 = vsel %vm358_vm2, %v355_v2, 0.0 }
 0x133   :  { %v361_v36 = vadd.f32 %v360_v4, %v359_v3 }
 0x135   :  { %v363_v25 = vadd.f32 %v362_v5, %v361_v36 }
 0x137   :  { %v365_v38 = vadd.f32 %v364_v6, %v363_v25 }
 0x139   :  { %v366_v7 = vrot.slane %v365_v38, 4 }
 0x13b   :  { %v367_v8 = vadd.f32 %v366_v7, %v365_v38 }
 0x13d   :  { %v368_v31 = vrot.slane %v367_v8, 2 }
 0x13f   :  { %v369_v9 = vadd.f32 %v368_v31, %v367_v8 }
 0x141   :  { %v370_v34 = vrot.slane %v369_v9, 1 }
 0x143   :  { %v371_v10 = vadd.f32 %v370_v34, %v369_v9 }
 0x145   :  { %v372_v11 = vmul.f32 0.03125, %v371_v10 }
 0x147   :  { %v374_v12 = vsub.f32 %v355_v2, %v372_v11  ;;  %v373_v13 = vsub.f32 %v354_v0, %v372_v11  ;;  %v375_v14 = vsub.f32 %v356_v30, %v372_v11  ;;  %v376_v15 = vsub.f32 %v357_v27, %v372_v11 }
 0x149   :  { %v378_v16 = vmul.f32 %v374_v12, %v374_v12  ;;  %v377_v17 = vmul.f32 %v373_v13, %v373_v13  ;;  %v397_v18 = vpack.c.bf16 %v374_v12, %v373_v13  ;;  %v379_v19 = vmul.f32 %v375_v14, %v375_v14 }
 0x14a   :  { %v380_v21 = vmul.f32 %v376_v15, %v376_v15  ;;  %v398_v22 = vpack.c.bf16 %v376_v15, %v375_v14 }
 0x14b   :  { %v382_v23 = vsel %vm358_vm2, %v378_v16, 0.0  ;;  %v381_v24 = vsel %vm358_vm2, %v377_v17, 0.0  ;;  %v399_v26 = vunpack.c.l.bf16 %v397_v18  ;;  %v400_v28 = vunpack.c.h.bf16 %v397_v18 }
 0x14c   :  { %v383_v29 = vadd.f32 %v382_v23, %v381_v24  ;;  %v384_v32 = vsel %vm358_vm2, %v379_v19, 0.0  ;;  %v386_v35 = vsel %vm358_vm2, %v380_v21, 0.0  ;;  %v401_v37 = vunpack.c.l.bf16 %v398_v22 }
 0x14d   :  { %v403_v39 = vsub.f32 %v373_v13, %v399_v26  ;;  %v404_v40 = vsub.f32 %v374_v12, %v400_v28  ;;  %v402_v41 = vunpack.c.h.bf16 %v398_v22 }
 0x14e   :  { %v385_v42 = vadd.f32 %v384_v32, %v383_v29  ;;  %v405_v43 = vsub.f32 %v375_v14, %v401_v37 }
 0x14f   :  { %v407_v44 = vpack.c.bf16 %v404_v40, %v403_v39  ;;  %v406_v45 = vsub.f32 %v376_v15, %v402_v41 }
 0x150   :  { %v387_v46 = vadd.f32 %v386_v35, %v385_v42 }
 0x151   :  { %612 = vmatpush3.bf16.msra.mxu1 %v407_v44  ;;  %v408_v47 = vpack.c.bf16 %v406_v45, %v405_v43 }
 0x152   :  { %613 = vmatprep.subr.bf16.mxu1 %v707_v20  ;;  %v388_v50 = vrot.slane %v387_v46, 4 }
 0x154   :  { %v389_v52 = vadd.f32 %v388_v50, %v387_v46 }
 0x155   :  { %614 = vmatpush3.bf16.msra.mxu1 %v408_v47 }
 0x156   :  { %619 = vmatprep.subr.bf16.mxu1 %v707_v20  ;;  %v390_v53 = vrot.slane %v389_v52, 2 }
 0x158   :  { %616 = vmatmul.mubr.msk.bf16.vlgmr.msra.gmra.mrb[0].mxu1 %vm50_vm0, %v409_v48  ;;  %v391_v55 = vadd.f32 %v390_v53, %v389_v52 }
 0x159   :  { %620 = vmatpush3.bf16.msra.mxu1 %v397_v18  ;;  %623 = vmatprep.mubr.msk.bf16.mxu1 %vm708_vm1, %v707_v20 }
 0x15a   :  { %621 = vmatprep.subr.bf16.mxu1 %v707_v20  ;;  %v392_v56 = vrot.slane %v391_v55, 1 }
 0x15c   :  { %v393_v51 = vadd.f32 %v392_v56, %v391_v55 }
 0x15d   :  { %622 = vmatpush3.bf16.msra.mxu1 %v398_v22 }
 0x15e   :  { %627 = vmatprep.subr.bf16.mxu1 %v707_v20  ;;  %v394_v57 = vmul.f32 0.03125, %v393_v51 }
 0x160   :  { %v395_v54 = vadd.f32 1e-05, %v394_v57 }
 0x162   :  { %680 = vrsqrt.f32 %v395_v54 }
 0x164   :  { %624 = vmatmul.mubr.msk.bf16.vlgmr.msra.gmra.mrb[0].mxu1 %vm50_vm0, %v409_v48 }
 0x165   :  { %628 = vmatpush3.bf16.msra.mxu1 %v397_v18  ;;  %631 = vmatprep.mubr.msk.bf16.mxu1 %vm708_vm1, %v707_v20 }
 0x166   :  { %629 = vmatprep.subr.bf16.mxu1 %v707_v20 }
 0x169   :  { %630 = vmatpush3.bf16.msra.mxu1 %v398_v22 }
 0x16c   :  { %v681_v58 = vpop.eup %680 }
 0x170   :  { %632 = vmatmul.mubr.msk.bf16.vlgmr.msra.gmra.mrb[0].mxu1 %vm50_vm0, %v493_v49 }
 0x243   :  { %v531_v59 = vpop.f32.mrb[0].mxu1 }
 0x244   :  { %v538_v20 = vmul.f32 %v681_v58, %v531_v59  ;;  %v633_v61 = vpop.f32.mrb[1].mxu1 }
 0x245   :  { %v534_v62 = vpop.f32.mrb[2].mxu1 }
 0x246   :  { %v545_v63 = vadd.f32 %v543_v60, %v538_v20  ;;  %v634_v0 = vpop.f32.mrb[3].mxu1 }
 0x248   :  { %547 = vst.msk [vmem:[#allocation2] sm:$0x3f] %vm546_vm3, %v545_v63 }
 0x249   :  { %693 = shalt.err (!%p690_p4)
}
 0x24a   :  { %s694_s25 = scalar_lea.hbm %s874_s7, 128 }
 0x24b   :  { %p695_p5 = scmp.ne.s32.totalorder %s874_s7, %s694_s25  ;;  %p698_p6 = scmp.lt.u32.totalorder %s694_s25, %s874_s7 }
 0x24d   :  { %p700_p7 = pnand %p698_p6, %p695_p5 }
 0x24f   :  { %703 = shalt.err (!%p700_p7)
}
 0x250   :  { %557 = dma.vmem_to_hbm [thread:$0]  %s555_s22, 128, %s874_s7, [#allocation3]  }
 0x251   :  { %704 = dma.done.wait [#allocation3], 128  }
 0x252   :  { %705 = vsyncadd [#allocation3], 4294967168 }
 0x253   :  { %561 = vsyncpa [#allocation3], 1 }

</bundles_post_ra>
